<compile_context>
chip_gen: v7x
topology: tpu7x:2x2x1
jax: 0.10.0
libtpu: 0.0.40
codegen_flags: <defaults>
</compile_context>

<pallas_src>
import functools

import jax
import jax.numpy as jnp
from jax.experimental import pallas as pl
from jax.experimental.pallas import tpu as pltpu

_LANE = 128
_SUBLANE = 8


def _round_up(v, m):
    return ((v + m - 1) // m) * m


def _pad_to(a, shape):
    return jnp.pad(a, [(0, s - d) for d, s in zip(a.shape, shape)])


def _encoder_kernel(xyT_ref, w1T_ref, b1T_ref, w2T_ref, b2T_ref, w3T_ref,
                    b3T_ref, out_ref, *, n_points, tb):
    """One grid step = tb batch elements (tb*n_points feature-major columns).

    xyT_ref : (Kp, n_points*tb)  VMEM, column index = n*tb + b_local
    w*T/b*T : transposed weights/biases, resident across the grid
    out_ref : (Dp, tb)           mean-pooled representation, transposed
    """
    xyT = xyT_ref[...]
    # Layer 1:  (Hp, Kp) @ (Kp, rows)   — padded Kp columns are exact zeros.
    h = jnp.dot(w1T_ref[...], xyT, preferred_element_type=jnp.float32) + b1T_ref[...]
    h = jnp.maximum(h, 0.0)
    # Layer 2:  (Hp, Hp) @ (Hp, rows)
    h = jnp.dot(w2T_ref[...], h, preferred_element_type=jnp.float32) + b2T_ref[...]
    h = jnp.maximum(h, 0.0)
    # Layer 3 (no activation after the last linear, matching _mlp convention)
    r = jnp.dot(w3T_ref[...], h, preferred_element_type=jnp.float32) + b3T_ref[...]
    # Mean over the n_points axis: columns are ordered point-major within the
    # tile, so each point block is a contiguous, 128-aligned (Dp, tb) slice.
    # N-1 cheap VPU adds, no MXU work, no relayout.
    acc = r[:, 0:tb]
    for n in range(1, n_points):
        acc = acc + r[:, n * tb:(n + 1) * tb]
    out_ref[...] = (acc * (1.0 / n_points)).astype(out_ref.dtype)


def deterministic_encoder(x, y, x_target, params, *, rows_per_step=4096):
    """Pallas wrapper.  x:(B,N,x_dim), y:(B,N,y_dim); x_target unused (0 cross-attn)."""
    del x_target  # only used when cross_attentions > 0
    w1, b1, w2, b2, w3, b3 = params
    B, N, x_dim = x.shape
    y_dim = y.shape[-1]
    hid = w1.shape[1]
    dout = w3.shape[1]

    if N == 0:  # module contract: empty context -> zero representation
        return jnp.zeros((B, dout), jnp.float32)

    feat = x_dim + y_dim
    Kp = _round_up(feat, _SUBLANE)   # input features on sublanes
    Hp = _round_up(hid, _SUBLANE)    # hidden features on sublanes (no 128 padding)
    Dp = _round_up(dout, _SUBLANE)   # output features on sublanes

    # Transposed, sublane-padded weights (zero padding keeps the math exact:
    # padded hidden rows stay exactly 0 through bias+ReLU).
    w1T = _pad_to(w1.T, (Hp, Kp))
    b1T = _pad_to(b1.reshape(1, hid).T, (Hp, 1))
    w2T = _pad_to(w2.T, (Hp, Hp))
    b2T = _pad_to(b2.reshape(1, hid).T, (Hp, 1))
    w3T = _pad_to(w3.T, (Dp, Hp))
    b3T = _pad_to(b3.reshape(1, dout).T, (Dp, 1))

    # ---- Batch tiling ------------------------------------------------------
    # tb = batch elements per grid step, multiple of 128 (lane axis of the
    # pooled output and of the per-point slices).  Target ~rows_per_step
    # feature-major columns per step; when B spans >= 2 lane blocks keep at
    # least 2 grid steps so v7x's two TensorCores both get work.
    b_blocks = -(-B // _LANE)
    blocks_per_tile = max(1, rows_per_step // (N * _LANE))
    if b_blocks >= 2:
        blocks_per_tile = min(blocks_per_tile, max(1, b_blocks // 2))
    blocks_per_tile = min(blocks_per_tile, b_blocks)
    tb = blocks_per_tile * _LANE
    num_tiles = -(-b_blocks // blocks_per_tile)
    b_pad = num_tiles * tb
    rows = N * tb  # columns per grid step

    # ---- Pack inputs feature-major, point-major within each batch tile -----
    # col(global) = tile*N*tb + n*tb + b_local  ;  row = feature (padded to Kp)
    xy = jnp.concatenate([x, y], axis=-1)                               # (B, N, F)
    xy = jnp.pad(xy, ((0, b_pad - B), (0, 0), (0, Kp - feat)))          # (b_pad, N, Kp)
    xyT = (xy.reshape(num_tiles, tb, N, Kp)
             .transpose(3, 0, 2, 1)                                     # (Kp, tiles, N, tb)
             .reshape(Kp, num_tiles * rows))

    kernel = functools.partial(_encoder_kernel, n_points=N, tb=tb)

    grid_spec = pltpu.PrefetchScalarGridSpec(
        num_scalar_prefetch=0,
        grid=(num_tiles,),
        in_specs=[
            pl.BlockSpec((Kp, rows), lambda i: (0, i)),   # packed inputs
            pl.BlockSpec((Hp, Kp), lambda i: (0, 0)),     # w1T   (resident)
            pl.BlockSpec((Hp, 1), lambda i: (0, 0)),      # b1T
            pl.BlockSpec((Hp, Hp), lambda i: (0, 0)),     # w2T
            pl.BlockSpec((Hp, 1), lambda i: (0, 0)),      # b2T
            pl.BlockSpec((Dp, Hp), lambda i: (0, 0)),     # w3T
            pl.BlockSpec((Dp, 1), lambda i: (0, 0)),      # b3T
        ],
        out_specs=pl.BlockSpec((Dp, tb), lambda i: (0, i)),
    )

    out_t = pl.pallas_call(
        kernel,
        out_shape=jax.ShapeDtypeStruct((Dp, b_pad), jnp.float32),
        grid_spec=grid_spec,
        compiler_params=pltpu.CompilerParams(
            dimension_semantics=("parallel",)),   # batch tiles split across TCs on v7x
    )(xyT, w1T, b1T, w2T, b2T, w3T, b3T)

    # Drop the sublane feature padding / batch padding; back to (B, dout).
    return out_t[:dout, :B].T


def init_params(key, x_dim, y_dim, hidden_dim, output_dim):
    """Deterministic parameter init (Glorot-ish scaling)."""
    din = x_dim + y_dim
    ks = jax.random.split(key, 6)

    def lin(kw, kb, fan_in, fan_out):
        scale = 1.0 / jnp.sqrt(jnp.float32(fan_in))
        w = jax.random.uniform(kw, (fan_in, fan_out), jnp.float32, -scale, scale)
        b = jax.random.uniform(kb, (1, fan_out), jnp.float32, -scale, scale)
        return w, b

    w1, b1 = lin(ks[0], ks[1], din, hidden_dim)
    w2, b2 = lin(ks[2], ks[3], hidden_dim, hidden_dim)
    w3, b3 = lin(ks[4], ks[5], hidden_dim, output_dim)
    return (w1, b1, w2, b2, w3, b3)


def _reference(x, y, params):
    """Pure-JAX reference of the same forward pass."""
    w1, b1, w2, b2, w3, b3 = params
    xy = jnp.concatenate([x, y], axis=-1)
    h = jnp.maximum(xy @ w1 + b1, 0.0)
    h = jnp.maximum(h @ w2 + b2, 0.0)
    r = h @ w3 + b3
    return jnp.mean(r, axis=1)


if __name__ == "__main__":
    # Small shapes consistent with the module's forward signature.
    B, N, x_dim, y_dim = 2, 8, 2, 1
    hidden_dim, output_dim = 32, 32

    key = jax.random.PRNGKey(0)
    kx, ky, kxt, kp = jax.random.split(key, 4)
    x = jax.random.normal(kx, (B, N, x_dim), jnp.float32)
    y = jax.random.normal(ky, (B, N, y_dim), jnp.float32)
    x_target = jax.random.normal(kxt, (B, N, x_dim), jnp.float32)

    params = init_params(kp, x_dim, y_dim, hidden_dim, output_dim)

    out = deterministic_encoder(x, y, x_target, params)
    out = jax.block_until_ready(out)

    ref = _reference(x, y, params)
    assert out.shape == (B, output_dim)
    assert jnp.allclose(out, ref, atol=1e-5, rtol=1e-5), "mismatch vs reference"

    print("KERNEL_OK")
</pallas_src>

<mosaic_0001>
module attributes {stable_mosaic.version = 11 : i64} {
  func.func @_encoder_kernel(%arg0: i32, %arg1: memref<8x1024xf32, #tpu.memory_space<vmem>>, %arg2: memref<32x8xf32, #tpu.memory_space<vmem>>, %arg3: memref<32x1xf32, #tpu.memory_space<vmem>>, %arg4: memref<32x32xf32, #tpu.memory_space<vmem>>, %arg5: memref<32x1xf32, #tpu.memory_space<vmem>>, %arg6: memref<32x32xf32, #tpu.memory_space<vmem>>, %arg7: memref<32x1xf32, #tpu.memory_space<vmem>>, %arg8: memref<32x128xf32, #tpu.memory_space<vmem>>) attributes {dimension_semantics = [#tpu.dimension_semantics<parallel>], iteration_bounds = array<i64: 1>, scalar_prefetch = 0 : i64, scratch_operands = 0 : i64, tpu.core_type = #tpu.core_type<tc>, window_params = [{transform_indices = @transform_0, window_bounds = array<i64: 8, 1024>}, {pipeline_mode = #tpu.pipeline_mode<synchronous>, transform_indices = @transform_1, window_bounds = array<i64: 32, 8>}, {pipeline_mode = #tpu.pipeline_mode<synchronous>, transform_indices = @transform_2, window_bounds = array<i64: 32, 1>}, {pipeline_mode = #tpu.pipeline_mode<synchronous>, transform_indices = @transform_3, window_bounds = array<i64: 32, 32>}, {pipeline_mode = #tpu.pipeline_mode<synchronous>, transform_indices = @transform_4, window_bounds = array<i64: 32, 1>}, {pipeline_mode = #tpu.pipeline_mode<synchronous>, transform_indices = @transform_5, window_bounds = array<i64: 32, 32>}, {pipeline_mode = #tpu.pipeline_mode<synchronous>, transform_indices = @transform_6, window_bounds = array<i64: 32, 1>}, {transform_indices = @transform_7, window_bounds = array<i64: 32, 128>}]} {
    %c0 = arith.constant 0 : index
    %c0_0 = arith.constant 0 : index
    %0 = vector.load %arg1[%c0, %c0_0] : memref<8x1024xf32, #tpu.memory_space<vmem>>, vector<8x1024xf32>
    %c0_1 = arith.constant 0 : index
    %c0_2 = arith.constant 0 : index
    %1 = vector.load %arg2[%c0_1, %c0_2] : memref<32x8xf32, #tpu.memory_space<vmem>>, vector<32x8xf32>
    %cst = arith.constant dense<0.000000e+00> : vector<32x1024xf32>
    %2 = tpu.matmul %1, %0, %cst {dimension_numbers = #tpu.dot_dimension_numbers<[1], [0], [0], [1], [0, 0, 1, 1], [], []>} : vector<32x8xf32>, vector<8x1024xf32>, vector<32x1024xf32> -> vector<32x1024xf32>
    %c0_3 = arith.constant 0 : index
    %c0_4 = arith.constant 0 : index
    %3 = vector.load %arg3[%c0_3, %c0_4] : memref<32x1xf32, #tpu.memory_space<vmem>>, vector<32x1xf32>
    %4 = vector.broadcast %3 : vector<32x1xf32> to vector<32x1024xf32>
    %5 = arith.addf %2, %4 : vector<32x1024xf32>
    %cst_5 = arith.constant 0.000000e+00 : f32
    %6 = vector.broadcast %cst_5 : f32 to vector<32x1024xf32>
    %7 = arith.maximumf %5, %6 : vector<32x1024xf32>
    %c0_6 = arith.constant 0 : index
    %c0_7 = arith.constant 0 : index
    %8 = vector.load %arg4[%c0_6, %c0_7] : memref<32x32xf32, #tpu.memory_space<vmem>>, vector<32x32xf32>
    %cst_8 = arith.constant dense<0.000000e+00> : vector<32x1024xf32>
    %9 = tpu.matmul %8, %7, %cst_8 {dimension_numbers = #tpu.dot_dimension_numbers<[1], [0], [0], [1], [0, 0, 1, 1], [], []>} : vector<32x32xf32>, vector<32x1024xf32>, vector<32x1024xf32> -> vector<32x1024xf32>
    %c0_9 = arith.constant 0 : index
    %c0_10 = arith.constant 0 : index
    %10 = vector.load %arg5[%c0_9, %c0_10] : memref<32x1xf32, #tpu.memory_space<vmem>>, vector<32x1xf32>
    %11 = vector.broadcast %10 : vector<32x1xf32> to vector<32x1024xf32>
    %12 = arith.addf %9, %11 : vector<32x1024xf32>
    %cst_11 = arith.constant 0.000000e+00 : f32
    %13 = vector.broadcast %cst_11 : f32 to vector<32x1024xf32>
    %14 = arith.maximumf %12, %13 : vector<32x1024xf32>
    %c0_12 = arith.constant 0 : index
    %c0_13 = arith.constant 0 : index
    %15 = vector.load %arg6[%c0_12, %c0_13] : memref<32x32xf32, #tpu.memory_space<vmem>>, vector<32x32xf32>
    %cst_14 = arith.constant dense<0.000000e+00> : vector<32x1024xf32>
    %16 = tpu.matmul %15, %14, %cst_14 {dimension_numbers = #tpu.dot_dimension_numbers<[1], [0], [0], [1], [0, 0, 1, 1], [], []>} : vector<32x32xf32>, vector<32x1024xf32>, vector<32x1024xf32> -> vector<32x1024xf32>
    %c0_15 = arith.constant 0 : index
    %c0_16 = arith.constant 0 : index
    %17 = vector.load %arg7[%c0_15, %c0_16] : memref<32x1xf32, #tpu.memory_space<vmem>>, vector<32x1xf32>
    %18 = vector.broadcast %17 : vector<32x1xf32> to vector<32x1024xf32>
    %19 = arith.addf %16, %18 : vector<32x1024xf32>
    %20 = vector.extract_strided_slice %19 {offsets = [0, 0], sizes = [32, 128], strides = [1, 1]} : vector<32x1024xf32> to vector<32x128xf32>
    %21 = vector.extract_strided_slice %19 {offsets = [0, 128], sizes = [32, 128], strides = [1, 1]} : vector<32x1024xf32> to vector<32x128xf32>
    %22 = arith.addf %20, %21 : vector<32x128xf32>
    %23 = vector.extract_strided_slice %19 {offsets = [0, 256], sizes = [32, 128], strides = [1, 1]} : vector<32x1024xf32> to vector<32x128xf32>
    %24 = arith.addf %22, %23 : vector<32x128xf32>
    %25 = vector.extract_strided_slice %19 {offsets = [0, 384], sizes = [32, 128], strides = [1, 1]} : vector<32x1024xf32> to vector<32x128xf32>
    %26 = arith.addf %24, %25 : vector<32x128xf32>
    %27 = vector.extract_strided_slice %19 {offsets = [0, 512], sizes = [32, 128], strides = [1, 1]} : vector<32x1024xf32> to vector<32x128xf32>
    %28 = arith.addf %26, %27 : vector<32x128xf32>
    %29 = vector.extract_strided_slice %19 {offsets = [0, 640], sizes = [32, 128], strides = [1, 1]} : vector<32x1024xf32> to vector<32x128xf32>
    %30 = arith.addf %28, %29 : vector<32x128xf32>
    %31 = vector.extract_strided_slice %19 {offsets = [0, 768], sizes = [32, 128], strides = [1, 1]} : vector<32x1024xf32> to vector<32x128xf32>
    %32 = arith.addf %30, %31 : vector<32x128xf32>
    %33 = vector.extract_strided_slice %19 {offsets = [0, 896], sizes = [32, 128], strides = [1, 1]} : vector<32x1024xf32> to vector<32x128xf32>
    %34 = arith.addf %32, %33 : vector<32x128xf32>
    %cst_17 = arith.constant 1.250000e-01 : f32
    %35 = vector.broadcast %cst_17 : f32 to vector<32x128xf32>
    %36 = arith.mulf %34, %35 : vector<32x128xf32>
    %c0_18 = arith.constant 0 : index
    %c0_19 = arith.constant 0 : index
    %37 = vector.load %arg8[%c0_18, %c0_19] : memref<32x128xf32, #tpu.memory_space<vmem>>, vector<32x128xf32>
    tpu.vector_store %arg8[%c0_18, %c0_19], %36 {strides = array<i32>} : memref<32x128xf32, #tpu.memory_space<vmem>>, vector<32x128xf32>,
    return
  }
  func.func @transform_0(%arg0: i32) -> (i32, i32) {
    %c0_i32 = arith.constant 0 : i32
    %c0_i32_0 = arith.constant 0 : i32
    return %c0_i32, %arg0 : i32, i32
  }
  func.func @transform_1(%arg0: i32) -> (i32, i32) {
    %c0_i32 = arith.constant 0 : i32
    %c0_i32_0 = arith.constant 0 : i32
    %c0_i32_1 = arith.constant 0 : i32
    return %c0_i32, %c0_i32_0 : i32, i32
  }
  func.func @transform_2(%arg0: i32) -> (i32, i32) {
    %c0_i32 = arith.constant 0 : i32
    %c0_i32_0 = arith.constant 0 : i32
    %c0_i32_1 = arith.constant 0 : i32
    return %c0_i32, %c0_i32_0 : i32, i32
  }
  func.func @transform_3(%arg0: i32) -> (i32, i32) {
    %c0_i32 = arith.constant 0 : i32
    %c0_i32_0 = arith.constant 0 : i32
    %c0_i32_1 = arith.constant 0 : i32
    return %c0_i32, %c0_i32_0 : i32, i32
  }
  func.func @transform_4(%arg0: i32) -> (i32, i32) {
    %c0_i32 = arith.constant 0 : i32
    %c0_i32_0 = arith.constant 0 : i32
    %c0_i32_1 = arith.constant 0 : i32
    return %c0_i32, %c0_i32_0 : i32, i32
  }
  func.func @transform_5(%arg0: i32) -> (i32, i32) {
    %c0_i32 = arith.constant 0 : i32
    %c0_i32_0 = arith.constant 0 : i32
    %c0_i32_1 = arith.constant 0 : i32
    return %c0_i32, %c0_i32_0 : i32, i32
  }
  func.func @transform_6(%arg0: i32) -> (i32, i32) {
    %c0_i32 = arith.constant 0 : i32
    %c0_i32_0 = arith.constant 0 : i32
    %c0_i32_1 = arith.constant 0 : i32
    return %c0_i32, %c0_i32_0 : i32, i32
  }
  func.func @transform_7(%arg0: i32) -> (i32, i32) {
    %c0_i32 = arith.constant 0 : i32
    %c0_i32_0 = arith.constant 0 : i32
    return %c0_i32, %arg0 : i32, i32
  }
}

</mosaic_0001>

<bundles_post_ra>
// kernel: tpu_custom_call.1
= control target key start
LH: loop header
LB: loop body
LE: loop exit
PB: predicated region body
PF: predicated region fallthrough
CT: control target
= control target key end

     0   :  { %vm63_vm0 = vcmask 64512   ;;  %v1484_v5 = vmov 0.0   ;;  %s1871_s0 = inlined_call_operand.vmem [shape: f32[8,1024], index: 0, kind: input, shape index: {}]   ;;  %s1872_s1 = inlined_call_operand.vmem [shape: f32[32,8], index: 1, kind: input, shape index: {}]   ;;  %s1873_s2 = inlined_call_operand.vmem [shape: f32[32,1], index: 2, kind: input, shape index: {}]   ;;  %s1874_s3 = inlined_call_operand.vmem [shape: f32[32,32], index: 3, kind: input, shape index: {}]   ;;  %s1875_s4 = inlined_call_operand.vmem [shape: f32[32,1], index: 4, kind: input, shape index: {}]   ;;  %s1876_s5 = inlined_call_operand.vmem [shape: f32[32,32], index: 5, kind: input, shape index: {}]   ;;  %s1877_s6 = inlined_call_operand.vmem [shape: f32[32,1], index: 6, kind: input, shape index: {}]   ;;  %s1878_s7 = inlined_call_operand.hbm [shape: f32[32,128], index: 7, kind: output, shape index: {}]  }
   0x1   :  { %v28_v0 = vld [vmem:[%s1871_s0 + $0x8] sm:$0xff]  ;;  %v30_v1 = vld [vmem:[%s1871_s0 + $0x18] sm:$0xff]  ;;  %v27_v2 = vld [vmem:[%s1871_s0] sm:$0xff]  ;;  %140 = vmatprep.mubr.f32.mxu0 %v1484_v5  ;;  %229 = vmatprep.mubr.f32.mxu1 %v1484_v5 }
   0x2   :  { %76 = vmatprep.subr.mxu0 %v28_v0  ;;  %165 = vmatprep.subr.mxu1 %v30_v1  ;;  %v29_v3 = vld [vmem:[%s1871_s0 + $0x10] sm:$0xff]  ;;  %v35_v4 = vld [vmem:[%s1872_s1] sm:$0xff]  ;;  %v32_v6 = vld [vmem:[%s1871_s0 + $0x28] sm:$0xff] }
   0x3   :  { %77 = vmatpush1.msra.mxu0 %v27_v2  ;;  %166 = vmatpush1.msra.mxu1 %v29_v3  ;;  %v34_v7 = vld [vmem:[%s1871_s0 + $0x38] sm:$0xff]  ;;  %v31_v8 = vld [vmem:[%s1871_s0 + $0x20] sm:$0xff]  ;;  %v33_v9 = vld [vmem:[%s1871_s0 + $0x30] sm:$0xff] }
   0x4   :  { %1341 = vmatmul.mubr.msk.f32.vlgmr.msra.gmra.mrb[0].mxu0 %vm63_vm0, %v35_v4  ;;  %1345 = vmatmul.mubr.msk.f32.vlgmr.msra.gmra.mrb[0].mxu1 %vm63_vm0, %v35_v4  ;;  %v36_v10 = vld [vmem:[%s1872_s1 + $0x8] sm:$0xff]  ;;  %v39_v11 = vld [vmem:[%s1873_s2] sm:$0xff]  ;;  %v41_v12 = vld [vmem:[%s1873_s2 + $0x10] sm:$0xff] }
   0x5   :  { %146 = vmatprep.mubr.f32.mxu0 %v1484_v5  ;;  %235 = vmatprep.mubr.f32.mxu1 %v1484_v5 }
   0x6   :  { %254 = vmatprep.subr.mxu0 %v32_v6  ;;  %343 = vmatprep.subr.mxu1 %v34_v7 }
   0x7   :  { %255 = vmatpush1.msra.mxu0 %v31_v8  ;;  %344 = vmatpush1.msra.mxu1 %v33_v9 }
   0x8   :  { %1342 = vmatmul.mubr.msk.f32.gmra.mrb[2].mxu0 %vm63_vm0, %v36_v10  ;;  %1346 = vmatmul.mubr.msk.f32.gmra.mrb[2].mxu1 %vm63_vm0, %v36_v10 }
   0x9   :  { %12 = vsyncpa [#allocation3], 0  ;;  %152 = vmatprep.mubr.f32.mxu0 %v1484_v5  ;;  %241 = vmatprep.mubr.f32.mxu1 %v1484_v5  ;;  %v37_v13 = vld [vmem:[%s1872_s1 + $0x10] sm:$0xff]  ;;  %v1485_v14 = vmov 0   ;;  %v40_v15 = vld [vmem:[%s1873_s2 + $0x8] sm:$0xff]  ;;  %vm492_vm1 = vcmask 261120  }
   0xa   :  { %1458 = vset.pattern.permute.xlu0 %v1485_v14  ;;  %1459 = vset.pattern.permute.xlu1 %v1485_v14  ;;  %v42_v16 = vld [vmem:[%s1873_s2 + $0x18] sm:$0xff]  ;;  %v468_v18 = vld [vmem:[%s1875_s4] sm:$0xff]  ;;  %v469_v19 = vld [vmem:[%s1875_s4 + $0x8] sm:$0xff] }
   0xb   :  { %45 = vperm.xlu0 %1458, %v39_v11   ;;  %55 = vperm.xlu1 %1459, %v41_v12   ;;  %v38_v17 = vld [vmem:[%s1872_s1 + $0x18] sm:$0xff]  ;;  %v470_v20 = vld [vmem:[%s1875_s4 + $0x10] sm:$0xff]  ;;  %v897_v22 = vld [vmem:[%s1877_s6] sm:$0xff] }
   0xc   :  { %1343 = vmatmul.mubr.msk.f32.gmra.mrb[4].mxu0 %vm63_vm0, %v37_v13  ;;  %1347 = vmatmul.mubr.msk.f32.gmra.mrb[4].mxu1 %vm63_vm0, %v37_v13  ;;  %v471_v21 = vld [vmem:[%s1875_s4 + $0x18] sm:$0xff]  ;;  %v898_v23 = vld [vmem:[%s1877_s6 + $0x8] sm:$0xff]  ;;  %v899_v24 = vld [vmem:[%s1877_s6 + $0x10] sm:$0xff] }
   0xd   :  { %158 = vmatprep.mubr.f32.mxu0 %v1484_v5  ;;  %247 = vmatprep.mubr.f32.mxu1 %v1484_v5  ;;  %v900_v25 = vld [vmem:[%s1877_s6 + $0x18] sm:$0xff] }
   0xf   :  { %50 = vperm.xlu0 %1458, %v40_v15   ;;  %60 = vperm.xlu1 %1459, %v42_v16  }
  0x10   :  { %1344 = vmatmul.mubr.msk.f32.gmra.mrb[6].mxu0 %vm63_vm0, %v38_v17  ;;  %1348 = vmatmul.mubr.msk.f32.gmra.mrb[6].mxu1 %vm63_vm0, %v38_v17 }
  0x11   :  { %318 = vmatprep.mubr.f32.mxu0 %v1484_v5  ;;  %407 = vmatprep.mubr.f32.mxu1 %v1484_v5 }
  0x13   :  { %474 = vperm.xlu0 %1458, %v468_v18   ;;  %479 = vperm.xlu1 %1459, %v469_v19  }
  0x14   :  { %1349 = vmatmul.mubr.msk.f32.vlgmr.msra.gmra.mrb[8].mxu0 %vm63_vm0, %v35_v4  ;;  %1353 = vmatmul.mubr.msk.f32.vlgmr.msra.gmra.mrb[8].mxu1 %vm63_vm0, %v35_v4 }
  0x15   :  { %324 = vmatprep.mubr.f32.mxu0 %v1484_v5  ;;  %413 = vmatprep.mubr.f32.mxu1 %v1484_v5 }
  0x17   :  { %484 = vperm.xlu0 %1458, %v470_v20   ;;  %489 = vperm.xlu1 %1459, %v471_v21  }
  0x18   :  { %1350 = vmatmul.mubr.msk.f32.gmra.mrb[10].mxu0 %vm63_vm0, %v36_v10  ;;  %1354 = vmatmul.mubr.msk.f32.gmra.mrb[10].mxu1 %vm63_vm0, %v36_v10 }
  0x19   :  { %330 = vmatprep.mubr.f32.mxu0 %v1484_v5  ;;  %419 = vmatprep.mubr.f32.mxu1 %v1484_v5 }
  0x1b   :  { %903 = vperm.xlu0 %1458, %v897_v22   ;;  %908 = vperm.xlu1 %1459, %v898_v23  }
  0x1c   :  { %1351 = vmatmul.mubr.msk.f32.gmra.mrb[12].mxu0 %vm63_vm0, %v37_v13  ;;  %1355 = vmatmul.mubr.msk.f32.gmra.mrb[12].mxu1 %vm63_vm0, %v37_v13 }
  0x1d   :  { %336 = vmatprep.mubr.f32.mxu0 %v1484_v5  ;;  %425 = vmatprep.mubr.f32.mxu1 %v1484_v5 }
  0x1f   :  { %913 = vperm.xlu0 %1458, %v899_v24   ;;  %918 = vperm.xlu1 %1459, %v900_v25  }
  0x20   :  { %1352 = vmatmul.mubr.msk.f32.gmra.mrb[14].mxu0 %vm63_vm0, %v38_v17  ;;  %1356 = vmatmul.mubr.msk.f32.gmra.mrb[14].mxu1 %vm63_vm0, %v38_v17 }
  0x21   :  { %569 = vmatprep.mubr.f32.mxu0 %v1484_v5  ;;  %658 = vmatprep.mubr.f32.mxu1 %v1484_v5 }
  0x8a   :  { %v1635_v26 = vpop.permute.xlu0 %45  ;;  %v1641_v34 = vpop.permute.xlu1 %55 }
  0x8e   :  { %v1639_v33 = vpop.permute.xlu0 %50  ;;  %v1649_v61 = vpop.permute.xlu1 %60 }
  0xd7   :  { %v142_v27 = vpop.f32.mrb[0].mxu0  ;;  %v231_v28 = vpop.f32.mrb[0].mxu1 }
  0xd8   :  { %v232_v29 = vadd.f32 %v231_v28, %v1635_v26  ;;  %v144_v30 = vpop.f32.mrb[1].mxu0  ;;  %v233_v31 = vpop.f32.mrb[1].mxu1  ;;  %v143_v35 = vadd.f32 %v142_v27, %v1635_v26 }
  0xd9   :  { %v234_v32 = vadd.f32 %v233_v31, %v1635_v26  ;;  %v145_v36 = vadd.f32 %v144_v30, %v1635_v26 }
  0xda   :  { %v434_v39 = vmax.f32 %v232_v29, 0.0  ;;  %v432_v47 = vmax.f32 %v143_v35, 0.0 }
  0xdb   :  { %v148_v37 = vpop.f32.mrb[2].mxu0  ;;  %v237_v38 = vpop.f32.mrb[2].mxu1  ;;  %v435_v44 = vmax.f32 %v234_v32, 0.0  ;;  %v433_v50 = vmax.f32 %v145_v36, 0.0 }
  0xdc   :  { %v149_v40 = vadd.f32 %v148_v37, %v1639_v33  ;;  %v238_v41 = vadd.f32 %v237_v38, %v1639_v33  ;;  %v150_v42 = vpop.f32.mrb[3].mxu0  ;;  %v239_v43 = vpop.f32.mrb[3].mxu1 }
  0xdd   :  { %v151_v45 = vadd.f32 %v150_v42, %v1639_v33  ;;  %v240_v46 = vadd.f32 %v239_v43, %v1639_v33 }
  0xde   :  { %v440_v48 = vmax.f32 %v149_v40, 0.0  ;;  %v442_v49 = vmax.f32 %v238_v41, 0.0  ;;  %v1668_v40 = vld [vmem:[%s1874_s3] sm:$0xff] }
  0xdf   :  { %v441_v51 = vmax.f32 %v151_v45, 0.0  ;;  %v443_v52 = vmax.f32 %v240_v46, 0.0  ;;  %v154_v53 = vpop.f32.mrb[4].mxu0  ;;  %v243_v54 = vpop.f32.mrb[4].mxu1 }
  0xe0   :  { %v1391_v55 = vpack.c.bf16 %v440_v48, %v432_v47  ;;  %v1399_v56 = vpack.c.bf16 %v442_v49, %v434_v39  ;;  %v156_v57 = vpop.f32.mrb[5].mxu0  ;;  %v245_v58 = vpop.f32.mrb[5].mxu1  ;;  %v155_v62 = vadd.f32 %v154_v53, %v1641_v34  ;;  %v244_v63 = vadd.f32 %v243_v54, %v1641_v34 }
  0xe1   :  { %v1389_v59 = vpack.c.bf16 %v441_v51, %v433_v50  ;;  %v1397_v60 = vpack.c.bf16 %v443_v52, %v435_v44  ;;  %v157_v0 = vadd.f32 %v156_v57, %v1641_v34  ;;  %v246_v1 = vadd.f32 %v245_v58, %v1641_v34 }
  0xe2   :  { %v448_v11 = vmax.f32 %v155_v62, 0.0  ;;  %v450_v12 = vmax.f32 %v244_v63, 0.0 }
  0xe3   :  { %v160_v2 = vpop.f32.mrb[6].mxu0  ;;  %v249_v3 = vpop.f32.mrb[6].mxu1  ;;  %1390 = vmatprep.subr.bf16.mxu0 %v1389_v59  ;;  %1398 = vmatprep.subr.bf16.mxu1 %v1397_v60  ;;  %v449_v15 = vmax.f32 %v157_v0, 0.0  ;;  %v451_v16 = vmax.f32 %v246_v1, 0.0 }
  0xe4   :  { %v161_v4 = vadd.f32 %v160_v2, %v1649_v61  ;;  %v250_v6 = vadd.f32 %v249_v3, %v1649_v61  ;;  %v162_v7 = vpop.f32.mrb[7].mxu0  ;;  %v251_v8 = vpop.f32.mrb[7].mxu1  ;;  %1392 = vmatpush1.bf16.msra.mxu0 %v1391_v55  ;;  %1400 = vmatpush1.bf16.msra.mxu1 %v1399_v56  ;;  %v465_v55 = vld [vmem:[%s1874_s3 + $0x8] sm:$0xff] }
  0xe5   :  { %v163_v9 = vadd.f32 %v162_v7, %v1649_v61  ;;  %v252_v10 = vadd.f32 %v251_v8, %v1649_v61 }
  0xe6   :  { %v456_v13 = vmax.f32 %v161_v4, 0.0  ;;  %v458_v14 = vmax.f32 %v250_v6, 0.0  ;;  %v466_v6 = vld [vmem:[%s1874_s3 + $0x10] sm:$0xff] }
  0xe7   :  { %v457_v17 = vmax.f32 %v163_v9, 0.0  ;;  %v459_v18 = vmax.f32 %v252_v10, 0.0  ;;  %v320_v19 = vpop.f32.mrb[8].mxu0  ;;  %v409_v20 = vpop.f32.mrb[8].mxu1 }
  0xe8   :  { %v1395_v21 = vpack.c.bf16 %v456_v13, %v448_v11  ;;  %v1403_v22 = vpack.c.bf16 %v458_v14, %v450_v12  ;;  %v322_v23 = vpop.f32.mrb[9].mxu0  ;;  %v411_v24 = vpop.f32.mrb[9].mxu1  ;;  %v321_v28 = vadd.f32 %v320_v19, %v1635_v26  ;;  %v410_v29 = vadd.f32 %v409_v20, %v1635_v26 }
  0xe9   :  { %v1393_v25 = vpack.c.bf16 %v457_v17, %v449_v15  ;;  %v1401_v27 = vpack.c.bf16 %v459_v18, %v451_v16  ;;  %v323_v30 = vadd.f32 %v322_v23, %v1635_v26  ;;  %v412_v31 = vadd.f32 %v411_v24, %v1635_v26  ;;  %v467_v17 = vld [vmem:[%s1874_s3 + $0x18] sm:$0xff]  ;;  %v1725_v24 = vpop.permute.xlu0 %474 }
  0xea   :  { %v436_v42 = vmax.f32 %v321_v28, 0.0  ;;  %v438_v43 = vmax.f32 %v410_v29, 0.0 }
  0xeb   :  { %v326_v32 = vpop.f32.mrb[10].mxu0  ;;  %v415_v35 = vpop.f32.mrb[10].mxu1  ;;  %1394 = vmatprep.subr.bf16.mxu0 %v1393_v25  ;;  %1402 = vmatprep.subr.bf16.mxu1 %v1401_v27  ;;  %v437_v46 = vmax.f32 %v323_v30, 0.0  ;;  %v439_v47 = vmax.f32 %v412_v31, 0.0 }
  0xec   :  { %v327_v36 = vadd.f32 %v326_v32, %v1639_v33  ;;  %v416_v37 = vadd.f32 %v415_v35, %v1639_v33  ;;  %v328_v38 = vpop.f32.mrb[11].mxu0  ;;  %v417_v39 = vpop.f32.mrb[11].mxu1  ;;  %1396 = vmatpush1.bf16.msra.mxu0 %v1395_v21  ;;  %1404 = vmatpush1.bf16.msra.mxu1 %v1403_v22 }
  0xed   :  { %v329_v26 = vadd.f32 %v328_v38, %v1639_v33  ;;  %v418_v41 = vadd.f32 %v417_v39, %v1639_v33  ;;  %v1727_v25 = vpop.permute.xlu1 %479 }
  0xee   :  { %v444_v44 = vmax.f32 %v327_v36, 0.0  ;;  %v446_v45 = vmax.f32 %v416_v37, 0.0 }
  0xef   :  { %v445_v48 = vmax.f32 %v329_v26, 0.0  ;;  %v447_v49 = vmax.f32 %v418_v41, 0.0  ;;  %v332_v50 = vpop.f32.mrb[12].mxu0  ;;  %v421_v51 = vpop.f32.mrb[12].mxu1  ;;  %1357 = vmatmul.mubr.msk.f32.vlgmr.msra.gmra.mrb[16].mxu0 %vm492_vm1, %v1668_v40  ;;  %1361 = vmatmul.mubr.msk.f32.vlgmr.msra.gmra.mrb[16].mxu1 %vm492_vm1, %v1668_v40 }
  0xf0   :  { %v1407_v52 = vpack.c.bf16 %v444_v44, %v436_v42  ;;  %v1415_v53 = vpack.c.bf16 %v446_v45, %v438_v43  ;;  %v334_v54 = vpop.f32.mrb[13].mxu0  ;;  %v423_v33 = vpop.f32.mrb[13].mxu1  ;;  %575 = vmatprep.mubr.f32.mxu0 %v1484_v5  ;;  %664 = vmatprep.mubr.f32.mxu1 %v1484_v5  ;;  %v333_v58 = vadd.f32 %v332_v50, %v1641_v34 }
  0xf1   :  { %v1405_v56 = vpack.c.bf16 %v445_v48, %v437_v46  ;;  %v1413_v57 = vpack.c.bf16 %v447_v49, %v439_v47  ;;  %v422_v59 = vadd.f32 %v421_v51, %v1641_v34  ;;  %v335_v60 = vadd.f32 %v334_v54, %v1641_v34  ;;  %v1737_v54 = vpop.permute.xlu0 %484 }
  0xf2   :  { %v424_v62 = vadd.f32 %v423_v33, %v1641_v34  ;;  %v452_v8 = vmax.f32 %v333_v58, 0.0 }
  0xf3   :  { %v338_v63 = vpop.f32.mrb[14].mxu0  ;;  %v427_v0 = vpop.f32.mrb[14].mxu1  ;;  %1358 = vmatmul.mubr.msk.f32.gmra.mrb[18].mxu0 %vm492_vm1, %v465_v55  ;;  %1362 = vmatmul.mubr.msk.f32.gmra.mrb[18].mxu1 %vm492_vm1, %v465_v55  ;;  %v454_v9 = vmax.f32 %v422_v59, 0.0  ;;  %v453_v12 = vmax.f32 %v335_v60, 0.0 }
  0xf4   :  { %v339_v1 = vadd.f32 %v338_v63, %v1649_v61  ;;  %v428_v2 = vadd.f32 %v427_v0, %v1649_v61  ;;  %1406 = vmatprep.subr.bf16.mxu0 %v1405_v56  ;;  %1414 = vmatprep.subr.bf16.mxu1 %v1413_v57  ;;  %v340_v3 = vpop.f32.mrb[15].mxu0  ;;  %v429_v4 = vpop.f32.mrb[15].mxu1  ;;  %v455_v13 = vmax.f32 %v424_v62, 0.0 }
  0xf5   :  { %v341_v34 = vadd.f32 %v340_v3, %v1649_v61  ;;  %v430_v7 = vadd.f32 %v429_v4, %v1649_v61  ;;  %1408 = vmatpush1.bf16.msra.mxu0 %v1407_v52  ;;  %1416 = vmatpush1.bf16.msra.mxu1 %v1415_v53  ;;  %v1739_v56 = vpop.permute.xlu1 %489 }
  0xf6   :  { %v460_v10 = vmax.f32 %v339_v1, 0.0  ;;  %v462_v11 = vmax.f32 %v428_v2, 0.0  ;;  %581 = vmatprep.mubr.f32.mxu0 %v1484_v5  ;;  %670 = vmatprep.mubr.f32.mxu1 %v1484_v5 }
  0xf7   :  { %v461_v14 = vmax.f32 %v341_v34, 0.0  ;;  %v463_v15 = vmax.f32 %v430_v7, 0.0  ;;  %1359 = vmatmul.mubr.msk.f32.gmra.mrb[20].mxu0 %vm492_vm1, %v466_v6  ;;  %1363 = vmatmul.mubr.msk.f32.gmra.mrb[20].mxu1 %vm492_vm1, %v466_v6 }
  0xf8   :  { %v1411_v16 = vpack.c.bf16 %v460_v10, %v452_v8  ;;  %v1419_v61 = vpack.c.bf16 %v462_v11, %v454_v9  ;;  %587 = vmatprep.mubr.f32.mxu0 %v1484_v5  ;;  %676 = vmatprep.mubr.f32.mxu1 %v1484_v5 }
  0xf9   :  { %v1409_v18 = vpack.c.bf16 %v461_v14, %v453_v12  ;;  %v1417_v19 = vpack.c.bf16 %v463_v15, %v455_v13 }
  0xfb   :  { %1360 = vmatmul.mubr.msk.f32.gmra.mrb[22].mxu0 %vm492_vm1, %v467_v17  ;;  %1364 = vmatmul.mubr.msk.f32.gmra.mrb[22].mxu1 %vm492_vm1, %v467_v17 }
  0xfc   :  { %1410 = vmatprep.subr.bf16.mxu0 %v1409_v18  ;;  %1418 = vmatprep.subr.bf16.mxu1 %v1417_v19 }
  0xfd   :  { %1412 = vmatpush1.bf16.msra.mxu0 %v1411_v16  ;;  %1420 = vmatpush1.bf16.msra.mxu1 %v1419_v61 }
  0xfe   :  { %747 = vmatprep.mubr.f32.mxu0 %v1484_v5  ;;  %836 = vmatprep.mubr.f32.mxu1 %v1484_v5 }
 0x100   :  { %1365 = vmatmul.mubr.msk.f32.vlgmr.msra.gmra.mrb[24].mxu0 %vm492_vm1, %v1668_v40  ;;  %1369 = vmatmul.mubr.msk.f32.vlgmr.msra.gmra.mrb[24].mxu1 %vm492_vm1, %v1668_v40 }
 0x101   :  { %753 = vmatprep.mubr.f32.mxu0 %v1484_v5  ;;  %842 = vmatprep.mubr.f32.mxu1 %v1484_v5 }
 0x104   :  { %1366 = vmatmul.mubr.msk.f32.gmra.mrb[26].mxu0 %vm492_vm1, %v465_v55  ;;  %1370 = vmatmul.mubr.msk.f32.gmra.mrb[26].mxu1 %vm492_vm1, %v465_v55 }
 0x105   :  { %759 = vmatprep.mubr.f32.mxu0 %v1484_v5  ;;  %848 = vmatprep.mubr.f32.mxu1 %v1484_v5 }
 0x108   :  { %1367 = vmatmul.mubr.msk.f32.gmra.mrb[28].mxu0 %vm492_vm1, %v466_v6  ;;  %1371 = vmatmul.mubr.msk.f32.gmra.mrb[28].mxu1 %vm492_vm1, %v466_v6 }
 0x109   :  { %765 = vmatprep.mubr.f32.mxu0 %v1484_v5  ;;  %854 = vmatprep.mubr.f32.mxu1 %v1484_v5 }
 0x10c   :  { %1368 = vmatmul.mubr.msk.f32.gmra.mrb[30].mxu0 %vm492_vm1, %v467_v17  ;;  %1372 = vmatmul.mubr.msk.f32.gmra.mrb[30].mxu1 %vm492_vm1, %v467_v17 }
 0x10d   :  { %997 = vmatprep.mubr.f32.mxu0 %v1484_v5  ;;  %1086 = vmatprep.mubr.f32.mxu1 %v1484_v5 }
 0x1c2   :  { %v571_v20 = vpop.f32.mrb[16].mxu0  ;;  %v660_v21 = vpop.f32.mrb[16].mxu1 }
 0x1c3   :  { %v573_v22 = vpop.f32.mrb[17].mxu0  ;;  %v662_v23 = vpop.f32.mrb[17].mxu1  ;;  %v572_v27 = vadd.f32 %v571_v20, %v1725_v24  ;;  %v661_v28 = vadd.f32 %v660_v21, %v1725_v24 }
 0x1c4   :  { %v574_v29 = vadd.f32 %v573_v22, %v1725_v24  ;;  %v663_v30 = vadd.f32 %v662_v23, %v1725_v24 }
 0x1c5   :  { %v861_v26 = vmax.f32 %v572_v27, 0.0  ;;  %v863_v41 = vmax.f32 %v661_v28, 0.0 }
 0x1c6   :  { %v577_v31 = vpop.f32.mrb[18].mxu0  ;;  %v666_v32 = vpop.f32.mrb[18].mxu1  ;;  %v862_v44 = vmax.f32 %v574_v29, 0.0  ;;  %v864_v45 = vmax.f32 %v663_v30, 0.0  ;;  %v1756_v30 = vld [vmem:[%s1876_s5] sm:$0xff] }
 0x1c7   :  { %v578_v35 = vadd.f32 %v577_v31, %v1727_v25  ;;  %v667_v36 = vadd.f32 %v666_v32, %v1727_v25  ;;  %v579_v37 = vpop.f32.mrb[19].mxu0  ;;  %v668_v38 = vpop.f32.mrb[19].mxu1 }
 0x1c8   :  { %v580_v39 = vadd.f32 %v579_v37, %v1727_v25  ;;  %v669_v40 = vadd.f32 %v668_v38, %v1727_v25 }
 0x1c9   :  { %v869_v42 = vmax.f32 %v578_v35, 0.0  ;;  %v871_v43 = vmax.f32 %v667_v36, 0.0 }
 0x1ca   :  { %v870_v46 = vmax.f32 %v580_v39, 0.0  ;;  %v872_v47 = vmax.f32 %v669_v40, 0.0  ;;  %v583_v48 = vpop.f32.mrb[20].mxu0  ;;  %v672_v49 = vpop.f32.mrb[20].mxu1 }
 0x1cb   :  { %v1423_v50 = vpack.c.bf16 %v869_v42, %v861_v26  ;;  %v1431_v51 = vpack.c.bf16 %v871_v43, %v863_v41  ;;  %v585_v52 = vpop.f32.mrb[21].mxu0  ;;  %v674_v53 = vpop.f32.mrb[21].mxu1  ;;  %v584_v57 = vadd.f32 %v583_v48, %v1737_v54  ;;  %v673_v58 = vadd.f32 %v672_v49, %v1737_v54  ;;  %v1769_v41 = vld [vmem:[%s1876_s5 + $0x8] sm:$0xff] }
 0x1cc   :  { %v1421_v33 = vpack.c.bf16 %v870_v46, %v862_v44  ;;  %v1429_v55 = vpack.c.bf16 %v872_v47, %v864_v45  ;;  %v586_v59 = vadd.f32 %v585_v52, %v1737_v54  ;;  %v675_v60 = vadd.f32 %v674_v53, %v1737_v54 }
 0x1cd   :  { %v877_v34 = vmax.f32 %v584_v57, 0.0  ;;  %v879_v7 = vmax.f32 %v673_v58, 0.0 }
 0x1ce   :  { %v589_v62 = vpop.f32.mrb[22].mxu0  ;;  %v678_v63 = vpop.f32.mrb[22].mxu1  ;;  %1422 = vmatprep.subr.bf16.mxu0 %v1421_v33  ;;  %1430 = vmatprep.subr.bf16.mxu1 %v1429_v55  ;;  %v878_v10 = vmax.f32 %v586_v59, 0.0  ;;  %v880_v11 = vmax.f32 %v675_v60, 0.0  ;;  %v895_v60 = vld [vmem:[%s1876_s5 + $0x10] sm:$0xff] }
 0x1cf   :  { %v590_v0 = vadd.f32 %v589_v62, %v1739_v56  ;;  %v679_v1 = vadd.f32 %v678_v63, %v1739_v56  ;;  %v591_v2 = vpop.f32.mrb[23].mxu0  ;;  %v680_v3 = vpop.f32.mrb[23].mxu1  ;;  %1424 = vmatpush1.bf16.msra.mxu0 %v1423_v50  ;;  %1432 = vmatpush1.bf16.msra.mxu1 %v1431_v51 }
 0x1d0   :  { %v592_v4 = vadd.f32 %v591_v2, %v1739_v56  ;;  %v681_v6 = vadd.f32 %v680_v3, %v1739_v56 }
 0x1d1   :  { %v885_v8 = vmax.f32 %v590_v0, 0.0  ;;  %v887_v9 = vmax.f32 %v679_v1, 0.0 }
 0x1d2   :  { %v886_v12 = vmax.f32 %v592_v4, 0.0  ;;  %v888_v13 = vmax.f32 %v681_v6, 0.0 }
 0x1d3   :  { %v1427_v14 = vpack.c.bf16 %v885_v8, %v877_v34  ;;  %v1435_v15 = vpack.c.bf16 %v887_v9, %v879_v7  ;;  %v749_v16 = vpop.f32.mrb[24].mxu0  ;;  %v838_v61 = vpop.f32.mrb[24].mxu1 }
 0x1d4   :  { %v1425_v17 = vpack.c.bf16 %v886_v12, %v878_v10  ;;  %v1433_v18 = vpack.c.bf16 %v888_v13, %v880_v11  ;;  %v751_v19 = vpop.f32.mrb[25].mxu0  ;;  %v840_v20 = vpop.f32.mrb[25].mxu1  ;;  %v750_v21 = vadd.f32 %v749_v16, %v1725_v24  ;;  %v839_v22 = vadd.f32 %v838_v61, %v1725_v24 }
 0x1d5   :  { %v752_v23 = vadd.f32 %v751_v19, %v1725_v24  ;;  %v841_v27 = vadd.f32 %v840_v20, %v1725_v24 }
 0x1d6   :  { %1426 = vmatprep.subr.bf16.mxu0 %v1425_v17  ;;  %1434 = vmatprep.subr.bf16.mxu1 %v1433_v18  ;;  %v865_v24 = vmax.f32 %v750_v21, 0.0  ;;  %v867_v39 = vmax.f32 %v839_v22, 0.0  ;;  %v1823_v21 = vpop.permute.xlu1 %908 }
 0x1d7   :  { %v755_v28 = vpop.f32.mrb[26].mxu0  ;;  %v844_v29 = vpop.f32.mrb[26].mxu1  ;;  %1428 = vmatpush1.bf16.msra.mxu0 %v1427_v14  ;;  %1436 = vmatpush1.bf16.msra.mxu1 %v1435_v15  ;;  %v866_v42 = vmax.f32 %v752_v23, 0.0  ;;  %v868_v43 = vmax.f32 %v841_v27, 0.0 }
 0x1d8   :  { %v756_v31 = vadd.f32 %v755_v28, %v1727_v25  ;;  %v845_v32 = vadd.f32 %v844_v29, %v1727_v25  ;;  %v757_v35 = vpop.f32.mrb[27].mxu0  ;;  %v846_v36 = vpop.f32.mrb[27].mxu1 }
 0x1d9   :  { %v758_v37 = vadd.f32 %v757_v35, %v1727_v25  ;;  %v847_v38 = vadd.f32 %v846_v36, %v1727_v25  ;;  %v1819_v15 = vpop.permute.xlu0 %903 }
 0x1da   :  { %v873_v40 = vmax.f32 %v756_v31, 0.0  ;;  %v875_v26 = vmax.f32 %v845_v32, 0.0  ;;  %1373 = vmatmul.mubr.msk.f32.vlgmr.msra.gmra.mrb[32].mxu0 %vm492_vm1, %v1756_v30  ;;  %1377 = vmatmul.mubr.msk.f32.vlgmr.msra.gmra.mrb[32].mxu1 %vm492_vm1, %v1756_v30 }
 0x1db   :  { %v874_v44 = vmax.f32 %v758_v37, 0.0  ;;  %v876_v45 = vmax.f32 %v847_v38, 0.0  ;;  %v761_v25 = vpop.f32.mrb[28].mxu0  ;;  %v850_v46 = vpop.f32.mrb[28].mxu1  ;;  %1003 = vmatprep.mubr.f32.mxu0 %v1484_v5  ;;  %1092 = vmatprep.mubr.f32.mxu1 %v1484_v5 }
 0x1dc   :  { %v1439_v47 = vpack.c.bf16 %v873_v40, %v865_v24  ;;  %v1447_v48 = vpack.c.bf16 %v875_v26, %v867_v39  ;;  %v763_v49 = vpop.f32.mrb[29].mxu0  ;;  %v852_v50 = vpop.f32.mrb[29].mxu1  ;;  %v762_v53 = vadd.f32 %v761_v25, %v1737_v54  ;;  %v851_v33 = vadd.f32 %v850_v46, %v1737_v54 }
 0x1dd   :  { %v1437_v51 = vpack.c.bf16 %v874_v44, %v866_v42  ;;  %v1445_v52 = vpack.c.bf16 %v876_v45, %v868_v43  ;;  %v764_v55 = vadd.f32 %v763_v49, %v1737_v54  ;;  %v853_v57 = vadd.f32 %v852_v50, %v1737_v54  ;;  %v1829_v36 = vpop.permute.xlu0 %913  ;;  %v1835_v25 = vpop.permute.xlu1 %918 }
 0x1de   :  { %1374 = vmatmul.mubr.msk.f32.gmra.mrb[34].mxu0 %vm492_vm1, %v1769_v41  ;;  %1378 = vmatmul.mubr.msk.f32.gmra.mrb[34].mxu1 %vm492_vm1, %v1769_v41  ;;  %v881_v3 = vmax.f32 %v762_v53, 0.0  ;;  %v883_v4 = vmax.f32 %v851_v33, 0.0 }
 0x1df   :  { %v767_v58 = vpop.f32.mrb[30].mxu0  ;;  %v856_v59 = vpop.f32.mrb[30].mxu1  ;;  %1438 = vmatprep.subr.bf16.mxu0 %v1437_v51  ;;  %1446 = vmatprep.subr.bf16.mxu1 %v1445_v52  ;;  %v882_v7 = vmax.f32 %v764_v55, 0.0  ;;  %v884_v8 = vmax.f32 %v853_v57, 0.0 }
 0x1e0   :  { %v768_v62 = vadd.f32 %v767_v58, %v1739_v56  ;;  %v857_v63 = vadd.f32 %v856_v59, %v1739_v56  ;;  %v769_v0 = vpop.f32.mrb[31].mxu0  ;;  %v858_v1 = vpop.f32.mrb[31].mxu1  ;;  %1440 = vmatpush1.bf16.msra.mxu0 %v1439_v47  ;;  %1448 = vmatpush1.bf16.msra.mxu1 %v1447_v48 }
 0x1e1   :  { %v770_v2 = vadd.f32 %v769_v0, %v1739_v56  ;;  %v859_v54 = vadd.f32 %v858_v1, %v1739_v56  ;;  %1009 = vmatprep.mubr.f32.mxu0 %v1484_v5  ;;  %1098 = vmatprep.mubr.f32.mxu1 %v1484_v5  ;;  %v896_v56 = vld [vmem:[%s1876_s5 + $0x18] sm:$0xff]  ;;  %s1486_s5 = smov [#allocation2]  }
 0x1e2   :  { %v889_v6 = vmax.f32 %v768_v62, 0.0  ;;  %v891_v34 = vmax.f32 %v857_v63, 0.0  ;;  %1375 = vmatmul.mubr.msk.f32.gmra.mrb[36].mxu0 %vm492_vm1, %v895_v60  ;;  %1379 = vmatmul.mubr.msk.f32.gmra.mrb[36].mxu1 %vm492_vm1, %v895_v60  ;;  %s1330_s2 = sshll.u32 %s1486_s5, 4  ;;  %s1331_s2 = int_to_ptr.vmem [resolvable:$true] %s1330_s2 }
 0x1e3   :  { %v890_v9 = vmax.f32 %v770_v2, 0.0  ;;  %v892_v10 = vmax.f32 %v859_v54, 0.0  ;;  %1015 = vmatprep.mubr.f32.mxu0 %v1484_v5  ;;  %1104 = vmatprep.mubr.f32.mxu1 %v1484_v5  ;;  %s1460_s1 = scalar_lea.vmem %s1331_s2, 512  ;;  %p1465_p1 = scmp.lt.s32.totalorder %s1331_s2, %s1331_s2 }
 0x1e4   :  { %v1443_v11 = vpack.c.bf16 %v889_v6, %v881_v3  ;;  %v1451_v12 = vpack.c.bf16 %v891_v34, %v883_v4  ;;  %p1461_p0 = scmp.ne.s32.totalorder %s1331_s2, %s1460_s1  ;;  %p1466_p2 = scmp.lt.s32.totalorder %s1460_s1, %s1460_s1 }
 0x1e5   :  { %v1441_v13 = vpack.c.bf16 %v890_v9, %v882_v7  ;;  %v1449_v14 = vpack.c.bf16 %v892_v10, %v884_v8 }
 0x1e6   :  { %1376 = vmatmul.mubr.msk.f32.gmra.mrb[38].mxu0 %vm492_vm1, %v896_v56  ;;  %1380 = vmatmul.mubr.msk.f32.gmra.mrb[38].mxu1 %vm492_vm1, %v896_v56  ;;  %p1467_p3 = por %p1466_p2, %p1465_p1 }
 0x1e7   :  { %1442 = vmatprep.subr.bf16.mxu0 %v1441_v13  ;;  %1450 = vmatprep.subr.bf16.mxu1 %v1449_v14 }
 0x1e8   :  { %1444 = vmatpush1.bf16.msra.mxu0 %v1443_v11  ;;  %1452 = vmatpush1.bf16.msra.mxu1 %v1451_v12  ;;  %p1468_p4 = pnand %p1467_p3, %p1461_p0 }
 0x1e9   :  { %1175 = vmatprep.mubr.f32.mxu0 %v1484_v5  ;;  %1264 = vmatprep.mubr.f32.mxu1 %v1484_v5 }
 0x1eb   :  { %1381 = vmatmul.mubr.msk.f32.vlgmr.msra.gmra.mrb[40].mxu0 %vm492_vm1, %v1756_v30  ;;  %1385 = vmatmul.mubr.msk.f32.vlgmr.msra.gmra.mrb[40].mxu1 %vm492_vm1, %v1756_v30 }
 0x1ec   :  { %1181 = vmatprep.mubr.f32.mxu0 %v1484_v5  ;;  %1270 = vmatprep.mubr.f32.mxu1 %v1484_v5 }
 0x1ef   :  { %1382 = vmatmul.mubr.msk.f32.gmra.mrb[42].mxu0 %vm492_vm1, %v1769_v41  ;;  %1386 = vmatmul.mubr.msk.f32.gmra.mrb[42].mxu1 %vm492_vm1, %v1769_v41 }
 0x1f0   :  { %1187 = vmatprep.mubr.f32.mxu0 %v1484_v5  ;;  %1276 = vmatprep.mubr.f32.mxu1 %v1484_v5 }
 0x1f3   :  { %1383 = vmatmul.mubr.msk.f32.gmra.mrb[44].mxu0 %vm492_vm1, %v895_v60  ;;  %1387 = vmatmul.mubr.msk.f32.gmra.mrb[44].mxu1 %vm492_vm1, %v895_v60 }
 0x1f4   :  { %1193 = vmatprep.mubr.f32.mxu0 %v1484_v5  ;;  %1282 = vmatprep.mubr.f32.mxu1 %v1484_v5 }
 0x1f7   :  { %1384 = vmatmul.mubr.msk.f32.gmra.mrb[46].mxu0 %vm492_vm1, %v896_v56  ;;  %1388 = vmatmul.mubr.msk.f32.gmra.mrb[46].mxu1 %vm492_vm1, %v896_v56 }
 0x2ad   :  { %v999_v16 = vpop.f32.mrb[32].mxu0  ;;  %v1088_v61 = vpop.f32.mrb[32].mxu1 }
 0x2ae   :  { %v1000_v17 = vadd.f32 %v999_v16, %v1819_v15  ;;  %v1001_v18 = vpop.f32.mrb[33].mxu0  ;;  %v1090_v19 = vpop.f32.mrb[33].mxu1  ;;  %v1089_v22 = vadd.f32 %v1088_v61, %v1819_v15 }
 0x2af   :  { %v1002_v20 = vadd.f32 %v1001_v18, %v1819_v15  ;;  %v1091_v31 = vadd.f32 %v1090_v19, %v1819_v15 }
 0x2b1   :  { %v1289_v23 = vadd.f32 %v1002_v20, %v1000_v17  ;;  %v1005_v5 = vpop.f32.mrb[34].mxu0  ;;  %v1094_v27 = vpop.f32.mrb[34].mxu1 }
 0x2b2   :  { %v1006_v28 = vadd.f32 %v1005_v5, %v1823_v21  ;;  %v1007_v29 = vpop.f32.mrb[35].mxu0  ;;  %v1096_v30 = vpop.f32.mrb[35].mxu1  ;;  %v1095_v38 = vadd.f32 %v1094_v27, %v1823_v21 }
 0x2b3   :  { %v1293_v32 = vadd.f32 %v1289_v23, %v1089_v22  ;;  %v1008_v35 = vadd.f32 %v1007_v29, %v1823_v21  ;;  %v1097_v43 = vadd.f32 %v1096_v30, %v1823_v21 }
 0x2b5   :  { %v1297_v37 = vadd.f32 %v1293_v32, %v1091_v31  ;;  %v1290_v24 = vadd.f32 %v1008_v35, %v1006_v28  ;;  %v1011_v39 = vpop.f32.mrb[36].mxu0  ;;  %v1100_v40 = vpop.f32.mrb[36].mxu1 }
 0x2b6   :  { %v1012_v26 = vadd.f32 %v1011_v39, %v1829_v36  ;;  %v1013_v41 = vpop.f32.mrb[37].mxu0  ;;  %v1102_v42 = vpop.f32.mrb[37].mxu1  ;;  %v1101_v47 = vadd.f32 %v1100_v40, %v1829_v36 }
 0x2b7   :  { %v1294_v44 = vadd.f32 %v1290_v24, %v1095_v38  ;;  %v1014_v45 = vadd.f32 %v1013_v41, %v1829_v36  ;;  %v1103_v33 = vadd.f32 %v1102_v42, %v1829_v36 }
 0x2b9   :  { %v1298_v46 = vadd.f32 %v1294_v44, %v1097_v43  ;;  %v1291_v48 = vadd.f32 %v1014_v45, %v1012_v26  ;;  %v1017_v49 = vpop.f32.mrb[38].mxu0  ;;  %v1106_v50 = vpop.f32.mrb[38].mxu1 }
 0x2ba   :  { %v1018_v51 = vadd.f32 %v1017_v49, %v1835_v25  ;;  %v1019_v52 = vpop.f32.mrb[39].mxu0  ;;  %v1108_v53 = vpop.f32.mrb[39].mxu1  ;;  %v1107_v59 = vadd.f32 %v1106_v50, %v1835_v25 }
 0x2bb   :  { %v1295_v55 = vadd.f32 %v1291_v48, %v1101_v47  ;;  %v1020_v57 = vadd.f32 %v1019_v52, %v1835_v25  ;;  %v1109_v0 = vadd.f32 %v1108_v53, %v1835_v25 }
 0x2bd   :  { %v1299_v58 = vadd.f32 %v1295_v55, %v1103_v33  ;;  %v1292_v60 = vadd.f32 %v1020_v57, %v1018_v51 }
 0x2be   :  { %v1177_v62 = vpop.f32.mrb[40].mxu0  ;;  %v1266_v63 = vpop.f32.mrb[40].mxu1 }
 0x2bf   :  { %v1296_v1 = vadd.f32 %v1292_v60, %v1107_v59  ;;  %v1178_v2 = vadd.f32 %v1177_v62, %v1819_v15  ;;  %v1179_v54 = vpop.f32.mrb[41].mxu0  ;;  %v1268_v3 = vpop.f32.mrb[41].mxu1  ;;  %v1267_v9 = vadd.f32 %v1266_v63, %v1819_v15 }
 0x2c0   :  { %v1180_v4 = vadd.f32 %v1179_v54, %v1819_v15  ;;  %v1269_v14 = vadd.f32 %v1268_v3, %v1819_v15 }
 0x2c1   :  { %v1300_v6 = vadd.f32 %v1296_v1, %v1109_v0  ;;  %v1301_v34 = vadd.f32 %v1297_v37, %v1178_v2 }
 0x2c2   :  { %v1183_v7 = vpop.f32.mrb[42].mxu0  ;;  %v1272_v8 = vpop.f32.mrb[42].mxu1 }
 0x2c3   :  { %v1305_v10 = vadd.f32 %v1301_v34, %v1180_v4  ;;  %v1184_v56 = vadd.f32 %v1183_v7, %v1823_v21  ;;  %v1185_v11 = vpop.f32.mrb[43].mxu0  ;;  %v1274_v12 = vpop.f32.mrb[43].mxu1  ;;  %v1273_v20 = vadd.f32 %v1272_v8, %v1823_v21 }
 0x2c4   :  { %v1186_v13 = vadd.f32 %v1185_v11, %v1823_v21  ;;  %v1275_v30 = vadd.f32 %v1274_v12, %v1823_v21 }
 0x2c5   :  { %v1309_v16 = vadd.f32 %v1305_v10, %v1267_v9  ;;  %v1302_v61 = vadd.f32 %v1298_v46, %v1184_v56 }
 0x2c6   :  { %v1189_v17 = vpop.f32.mrb[44].mxu0  ;;  %v1278_v18 = vpop.f32.mrb[44].mxu1 }
 0x2c7   :  { %v1313_v19 = vadd.f32 %v1309_v16, %v1269_v14  ;;  %v1306_v22 = vadd.f32 %v1302_v61, %v1186_v13  ;;  %v1190_v23 = vadd.f32 %v1189_v17, %v1829_v36  ;;  %v1191_v5 = vpop.f32.mrb[45].mxu0  ;;  %v1280_v27 = vpop.f32.mrb[45].mxu1  ;;  %v1279_v38 = vadd.f32 %v1278_v18, %v1829_v36 }
 0x2c8   :  { %v1192_v28 = vadd.f32 %v1191_v5, %v1829_v36  ;;  %v1281_v43 = vadd.f32 %v1280_v27, %v1829_v36 }
 0x2c9   :  { %v1317_v29 = vmul.f32 0.125, %v1313_v19  ;;  %v1310_v31 = vadd.f32 %v1306_v22, %v1273_v20  ;;  %v1303_v32 = vadd.f32 %v1299_v58, %v1190_v23 }
 0x2ca   :  { %v1195_v15 = vpop.f32.mrb[46].mxu0  ;;  %v1284_v35 = vpop.f32.mrb[46].mxu1 }
 0x2cb   :  { %1321 = vst [vmem:[#allocation2] sm:$0xff] %v1317_v29  ;;  %v1314_v37 = vadd.f32 %v1310_v31, %v1275_v30  ;;  %v1307_v24 = vadd.f32 %v1303_v32, %v1192_v28  ;;  %v1196_v39 = vadd.f32 %v1195_v15, %v1835_v25  ;;  %v1197_v40 = vpop.f32.mrb[47].mxu0  ;;  %v1286_v26 = vpop.f32.mrb[47].mxu1  ;;  %v1285_v46 = vadd.f32 %v1284_v35, %v1835_v25 }
 0x2cc   :  { %v1198_v41 = vadd.f32 %v1197_v40, %v1835_v25  ;;  %v1287_v49 = vadd.f32 %v1286_v26, %v1835_v25 }
 0x2cd   :  { %v1318_v42 = vmul.f32 0.125, %v1314_v37  ;;  %v1311_v44 = vadd.f32 %v1307_v24, %v1279_v38  ;;  %v1304_v21 = vadd.f32 %v1300_v6, %v1196_v39 }
 0x2cf   :  { %1322 = vst [vmem:[#allocation2 + $0x8] sm:$0xff] %v1318_v42  ;;  %v1315_v45 = vadd.f32 %v1311_v44, %v1281_v43  ;;  %v1308_v47 = vadd.f32 %v1304_v21, %v1198_v41 }
 0x2d1   :  { %v1319_v48 = vmul.f32 0.125, %v1315_v45  ;;  %v1312_v50 = vadd.f32 %v1308_v47, %v1285_v46 }
 0x2d3   :  { %1323 = vst [vmem:[#allocation2 + $0x10] sm:$0xff] %v1319_v48  ;;  %v1316_v51 = vadd.f32 %v1312_v50, %v1287_v49 }
 0x2d5   :  { %v1320_v52 = vmul.f32 0.125, %v1316_v51 }
 0x2d7   :  { %1324 = vst [vmem:[#allocation2 + $0x18] sm:$0xff] %v1320_v52 }
 0x2d8   :  { %1471 = shalt.err (!%p1468_p4)
}
 0x2d9   :  { %s1472_s14 = scalar_lea.hbm %s1878_s7, 512 }
 0x2da   :  { %p1473_p5 = scmp.ne.s32.totalorder %s1878_s7, %s1472_s14  ;;  %p1476_p6 = scmp.lt.u32.totalorder %s1472_s14, %s1878_s7 }
 0x2dc   :  { %p1478_p7 = pnand %p1476_p6, %p1473_p5 }
 0x2de   :  { %1481 = shalt.err (!%p1478_p7)
}
 0x2df   :  { %s1487_s4 = smov 128   ;;  %s1488_s19 = smov 8  }
 0x2e0   :  { %1336 = dma.vmem_to_hbm [thread:$0]  %s1331_s2, 512, %s1878_s7, [#allocation3], %s1487_s4, %s1487_s4, %s1488_s19  }
 0x2e1   :  { %1482 = dma.done.wait [#allocation3], 512  }
 0x2e2   :  { %1483 = vsyncadd [#allocation3], 4294966784 }
 0x2e3   :  { %1340 = vsyncpa [#allocation3], 1 }

</bundles_post_ra>
